<compile_context>
chip_gen: v7x
topology: tpu7x:2x2x1
jax: 0.10.0
libtpu: 0.0.40
codegen_flags: <defaults>
</compile_context>

<pallas_src>
import math
import functools

import jax
import jax.numpy as jnp
from jax.experimental import pallas as pl
from jax.experimental.pallas import tpu as pltpu


def _round_up(v, m):
    return (v + m - 1) // m * m


def _pad_axis(x, mult, axis):
    pad = (-x.shape[axis]) % mult
    if pad == 0:
        return x
    widths = [(0, 0)] * x.ndim
    widths[axis] = (0, pad)
    return jnp.pad(x, widths)


# ---------------------------------------------------------------------------
# Pallas kernels
# ---------------------------------------------------------------------------
def _gemm_kernel(x_ref, w_ref, b_ref, o_ref, *, relu):
    """out = act(x @ w + bias).  Full-K tile: single MXU pass, f32 accumulate."""
    y = jnp.dot(x_ref[...], w_ref[...], preferred_element_type=jnp.float32)
    y = y + b_ref[...]
    if relu:
        y = jnp.maximum(y, 0.0)
    o_ref[...] = y.astype(o_ref.dtype)


def _gemm_res_kernel(x_ref, w_ref, b_ref, r_ref, o_ref, *, relu):
    """out = act(x @ w + bias + residual)."""
    y = jnp.dot(x_ref[...], w_ref[...], preferred_element_type=jnp.float32)
    y = y + b_ref[...] + r_ref[...].astype(jnp.float32)
    if relu:
        y = jnp.maximum(y, 0.0)
    o_ref[...] = y.astype(o_ref.dtype)


def _tail_kernel(x_ref, w_ref, o_ref):
    """Fused relu -> global average pool -> fc (bias-free linear)."""
    x = jnp.maximum(x_ref[...].astype(jnp.float32), 0.0)   # (N, H*W, C)
    pooled = jnp.mean(x, axis=1)                            # (N, C)
    o_ref[...] = jnp.dot(pooled, w_ref[...],
                         preferred_element_type=jnp.float32)


# ---------------------------------------------------------------------------
# GEMM wrapper: per-call tile selection, bf16 operands, fused BN/res/ReLU
# ---------------------------------------------------------------------------
def gemm_bias_act(x, w, bias, residual=None, relu=False, out_dtype=jnp.bfloat16):
    """act((x @ w) + bias [+ residual]); BN scale is pre-folded into w columns."""
    M, K = x.shape
    N = w.shape[1]
    Kp = _round_up(K, 128)                 # full-K tile (no K grid axis)
    Np = _round_up(N, 128)
    TM = min(256, _round_up(M, 16))        # 16: bf16 sublane tile
    Mp = _round_up(M, TM)
    gm = Mp // TM
    # Prefer tile choices that keep >=2 grid programs (v7x: 2 TensorCores/chip).
    TN = 256 if (gm >= 2 and Np % 256 == 0) else 128
    gn = Np // TN

    xp = _pad_axis(_pad_axis(x.astype(jnp.bfloat16), TM, 0), 128, 1)
    wp = _pad_axis(_pad_axis(w.astype(jnp.bfloat16), 128, 0), 128, 1)
    bp = _pad_axis(bias.astype(jnp.float32).reshape(1, N), 128, 1)

    in_specs = [
        pl.BlockSpec((TM, Kp), lambda i, j: (i, 0)),
        pl.BlockSpec((Kp, TN), lambda i, j: (0, j)),
        pl.BlockSpec((1, TN), lambda i, j: (0, j)),
    ]
    args = [xp, wp, bp]
    if residual is not None:
        rp = _pad_axis(_pad_axis(residual.astype(jnp.bfloat16), TM, 0), 128, 1)
        in_specs.append(pl.BlockSpec((TM, TN), lambda i, j: (i, j)))
        args.append(rp)
        kernel = functools.partial(_gemm_res_kernel, relu=relu)
    else:
        kernel = functools.partial(_gemm_kernel, relu=relu)

    out = pl.pallas_call(
        kernel,
        out_shape=jax.ShapeDtypeStruct((Mp, Np), out_dtype),
        grid_spec=pltpu.PrefetchScalarGridSpec(
            num_scalar_prefetch=0,
            grid=(gm, gn),
            in_specs=in_specs,
            out_specs=pl.BlockSpec((TM, TN), lambda i, j: (i, j)),
        ),
        compiler_params=pltpu.CompilerParams(
            dimension_semantics=("parallel", "parallel")),
    )(*args)
    return out[:M, :N]


# ---------------------------------------------------------------------------
# Conv / tail wrappers (padding, im2col, parameter folding)
# ---------------------------------------------------------------------------
def im2col(x_nhwc, kh, kw, stride, pad):
    N, H, W, C = x_nhwc.shape
    xp = jnp.pad(x_nhwc, ((0, 0), (pad, pad), (pad, pad), (0, 0)))
    Ho = (H + 2 * pad - kh) // stride + 1
    Wo = (W + 2 * pad - kw) // stride + 1
    cols = []
    for i in range(kh):
        for j in range(kw):
            cols.append(xp[:, i:i + stride * Ho:stride, j:j + stride * Wo:stride, :])
    patches = jnp.concatenate(cols, axis=-1)  # (N, Ho, Wo, kh*kw*C)
    return patches.reshape(N * Ho * Wo, kh * kw * C), (N, Ho, Wo)


def conv_bn(x_nhwc, conv_w, bn, stride, pad, relu=False, residual=None):
    """Conv2d (PyTorch OIHW weight) + folded BatchNorm (+residual, +ReLU)."""
    cout, cin, kh, kw = conv_w.shape
    patches, (N, Ho, Wo) = im2col(x_nhwc, kh, kw, stride, pad)
    gamma, beta, mean, var = bn
    scale = gamma / jnp.sqrt(var + 1e-5)
    bias = beta - mean * scale
    # column order of im2col is (kh, kw, cin) -> reorder weights to match;
    # fold the BN scale directly into the weight columns.
    w_mat = jnp.transpose(conv_w, (2, 3, 1, 0)).reshape(kh * kw * cin, cout)
    w_mat = w_mat * scale[None, :]
    res_mat = None if residual is None else residual.reshape(N * Ho * Wo, cout)
    out = gemm_bias_act(patches, w_mat, bias, residual=res_mat, relu=relu)
    return out.reshape(N, Ho, Wo, cout)


def relu_avgpool_fc(h_nhwc, fc_w):
    """x = relu(x); x = avgpool(x); x = x.view(N,-1); x = fc(x)  -- one kernel.

    Global mean over spatial equals AvgPool2d(4) because the final feature map
    of the num_classes==10 (CIFAR, 32x32) path is exactly 4x4.
    """
    N, H, W, C = h_nhwc.shape
    ncls = fc_w.shape[0]
    ncls_p = _round_up(ncls, 128)
    x = h_nhwc.reshape(N, H * W, C).astype(jnp.bfloat16)
    w = _pad_axis(fc_w.T.astype(jnp.float32), 128, 1)   # (C, ncls_p)
    out = pl.pallas_call(
        _tail_kernel,
        out_shape=jax.ShapeDtypeStruct((N, ncls_p), jnp.float32),
    )(x, w)
    return out[:, :ncls]


# ---------------------------------------------------------------------------
# Parameter construction (deterministic, mirrors the PyTorch __init__)
# ---------------------------------------------------------------------------
def init_bn(c):
    return (jnp.ones(c, jnp.float32), jnp.zeros(c, jnp.float32),
            jnp.zeros(c, jnp.float32), jnp.ones(c, jnp.float32))


def init_conv(key, cin, cout, k):
    n = k * k * cout
    return jax.random.normal(key, (cout, cin, k, k), jnp.float32) * math.sqrt(2.0 / n)


def init_basic_block(key, cin, planes, stride):
    ks = jax.random.split(key, 3)
    p = {
        "conv1": init_conv(ks[0], cin, planes, 3), "bn1": init_bn(planes),
        "conv2": init_conv(ks[1], planes, planes, 3), "bn2": init_bn(planes),
        "stride": stride, "downsample": None,
    }
    if stride != 1 or cin != planes:
        p["downsample"] = (init_conv(ks[2], cin, planes, 1), init_bn(planes))
    return p


def init_resnet(key, layers=(1, 1, 1, 1), num_classes=10):
    keys = jax.random.split(key, 2 + sum(layers))
    params = {"conv1": init_conv(keys[0], 3, 64, 3), "bn1": init_bn(64)}
    inplanes, ki, blocks = 64, 1, []
    for planes, nblk, stride in zip((64, 128, 256, 512), layers, (1, 2, 2, 2)):
        layer = []
        for b in range(nblk):
            layer.append(init_basic_block(keys[ki], inplanes,
                                          planes, stride if b == 0 else 1))
            ki += 1
            inplanes = planes
        blocks.append(layer)
    params["layers"] = blocks
    bound = 1.0 / math.sqrt(512)
    params["fc_w"] = jax.random.uniform(keys[ki], (num_classes, 512),
                                        jnp.float32, -bound, bound)
    return params


# ---------------------------------------------------------------------------
# Forward pass (matches ResNet.forward of the reference module, CIFAR path)
# ---------------------------------------------------------------------------
def basic_block_fwd(x, p):
    out = conv_bn(x, p["conv1"], p["bn1"], p["stride"], 1, relu=True)
    if p["downsample"] is not None:
        dw, dbn = p["downsample"]
        identity = conv_bn(x, dw, dbn, p["stride"], 0, relu=False)
    else:
        identity = x
    out = conv_bn(out, p["conv2"], p["bn2"], 1, 1, relu=True, residual=identity)
    return out


def resnet_forward(params, x_nchw):
    x = jnp.transpose(x_nchw, (0, 2, 3, 1))  # NCHW -> NHWC
    # conv1 -> bn1 (note: no ReLU here, exactly as in the reference forward)
    h = conv_bn(x, params["conv1"], params["bn1"], 1, 1, relu=False)
    for layer in params["layers"]:
        for blk in layer:
            h = basic_block_fwd(h, blk)
    # x = relu(x); x = avgpool(x); x = x.view(N,-1); x = fc(x)   (fused kernel)
    return relu_avgpool_fc(h, params["fc_w"])


if __name__ == "__main__":
    key = jax.random.PRNGKey(0)
    kp, kx = jax.random.split(key)
    params = init_resnet(kp, layers=(1, 1, 1, 1), num_classes=10)
    x = jax.random.normal(kx, (2, 3, 32, 32), jnp.float32)  # NCHW like PyTorch
    out = resnet_forward(params, x)
    out = jax.block_until_ready(out)
    assert out.shape == (2, 10), out.shape
    assert bool(jnp.all(jnp.isfinite(out)))
    print("KERNEL_OK")
</pallas_src>

<mosaic_0001>
module attributes {stable_mosaic.version = 11 : i64} {
  func.func @_gemm_kernel(%arg0: i32, %arg1: i32, %arg2: memref<256x128xbf16, #tpu.memory_space<vmem>>, %arg3: memref<128x128xbf16, #tpu.memory_space<vmem>>, %arg4: memref<1x128xf32, #tpu.memory_space<vmem>>, %arg5: memref<256x128xbf16, #tpu.memory_space<vmem>>) attributes {dimension_semantics = [#tpu.dimension_semantics<parallel>, #tpu.dimension_semantics<parallel>], iteration_bounds = array<i64: 8, 1>, scalar_prefetch = 0 : i64, scratch_operands = 0 : i64, tpu.core_type = #tpu.core_type<tc>, window_params = [{transform_indices = @transform_0, window_bounds = array<i64: 256, 128>}, {transform_indices = @transform_1, window_bounds = array<i64: 128, 128>}, {transform_indices = @transform_2, window_bounds = array<i64: 1, 128>}, {transform_indices = @transform_3, window_bounds = array<i64: 256, 128>}]} {
    %c0 = arith.constant 0 : index
    %c0_0 = arith.constant 0 : index
    %0 = vector.load %arg2[%c0, %c0_0] : memref<256x128xbf16, #tpu.memory_space<vmem>>, vector<256x128xbf16>
    %c0_1 = arith.constant 0 : index
    %c0_2 = arith.constant 0 : index
    %1 = vector.load %arg3[%c0_1, %c0_2] : memref<128x128xbf16, #tpu.memory_space<vmem>>, vector<128x128xbf16>
    %cst = arith.constant dense<0.000000e+00> : vector<256x128xf32>
    %2 = tpu.matmul %0, %1, %cst {dimension_numbers = #tpu.dot_dimension_numbers<[1], [0], [0], [1], [0, 0, 1, 1], [], []>} : vector<256x128xbf16>, vector<128x128xbf16>, vector<256x128xf32> -> vector<256x128xf32>
    %c0_3 = arith.constant 0 : index
    %c0_4 = arith.constant 0 : index
    %3 = vector.load %arg4[%c0_3, %c0_4] : memref<1x128xf32, #tpu.memory_space<vmem>>, vector<1x128xf32>
    %4 = vector.broadcast %3 : vector<1x128xf32> to vector<256x128xf32>
    %5 = arith.addf %2, %4 : vector<256x128xf32>
    %6 = arith.truncf %5 : vector<256x128xf32> to vector<256x128xbf16>
    %c0_5 = arith.constant 0 : index
    %c0_6 = arith.constant 0 : index
    %7 = vector.load %arg5[%c0_5, %c0_6] : memref<256x128xbf16, #tpu.memory_space<vmem>>, vector<256x128xbf16>
    tpu.vector_store %arg5[%c0_5, %c0_6], %6 {strides = array<i32>} : memref<256x128xbf16, #tpu.memory_space<vmem>>, vector<256x128xbf16>,
    return
  }
  func.func @transform_0(%arg0: i32, %arg1: i32) -> (i32, i32) {
    %c0_i32 = arith.constant 0 : i32
    %c0_i32_0 = arith.constant 0 : i32
    return %arg0, %c0_i32 : i32, i32
  }
  func.func @transform_1(%arg0: i32, %arg1: i32) -> (i32, i32) {
    %c0_i32 = arith.constant 0 : i32
    %c0_i32_0 = arith.constant 0 : i32
    return %c0_i32, %arg1 : i32, i32
  }
  func.func @transform_2(%arg0: i32, %arg1: i32) -> (i32, i32) {
    %c0_i32 = arith.constant 0 : i32
    %c0_i32_0 = arith.constant 0 : i32
    return %c0_i32, %arg1 : i32, i32
  }
  func.func @transform_3(%arg0: i32, %arg1: i32) -> (i32, i32) {
    %c0_i32 = arith.constant 0 : i32
    return %arg0, %arg1 : i32, i32
  }
}

</mosaic_0001>

<bundles_post_ra>
// kernel: tpu_custom_call.1
= control target key start
LH: loop header
LB: loop body
LE: loop exit
PB: predicated region body
PF: predicated region fallthrough
CT: control target
= control target key end

     0   :  { %8 = vsyncpa [#allocation3], 0  ;;  %s1751_s0 = inlined_call_operand.hbm [shape: bf16[2048,128], index: 0, kind: input, shape index: {}]   ;;  %s1752_s1 = inlined_call_operand.hbm [shape: bf16[128,128], index: 1, kind: input, shape index: {}]   ;;  %s1753_s2 = inlined_call_operand.vmem [shape: f32[1,128], index: 2, kind: input, shape index: {}]   ;;  %s1754_s3 = inlined_call_operand.hbm [shape: bf16[2048,128], index: 3, kind: output, shape index: {}]  }
   0x1   :  { %10 = vsyncpa [#allocation3 + $0x1], 0 }
   0x2   :  { %11 = vsyncpa [#allocation6], 0 }
   0x3   :  { %12 = vsyncpa [#allocation4], 0 }
   0x4   :  { %14 = vsyncpa [#allocation4 + $0x1], 0  ;;  %s1450_s12 = smov 0   ;;  %s1452_s13 = smov 0  }
   0x5   :  { %s1454_s14 = smov 0   ;;  %s1456_s15 = smov 0  }
   0x6   :  { %s1458_s16 = smov 0   ;;  %s1460_s17 = smov 0  }
   0x7 LB: > { %s884_s18 = sadd.s32 4294967295, %s1421_s17   ;;  %s885_s19 = sadd.s32 4294967294, %s1421_s17   ;;  %s1421_s17 = sphi %s1460_s17, %s20_s17   ;;  %s1417_s16 = sphi %s1458_s16, %s1777_s16   ;;  %s1413_s15 = sphi %s1456_s15, %s1776_s15   ;;  %s1409_s14 = sphi %s1454_s14, %s1775_s14   ;;  %s1405_s13 = sphi %s1452_s13, %s1774_s13   ;;  %s1401_s12 = sphi %s1450_s12, %s1773_s12  }
   0x8   : > { %p52_p0 = scmp.ne.s32.totalorder %s1405_s13, %s1401_s12  ;;  %p1484_p1 = scmp.eq.s32.totalorder %s884_s18, 0 }
   0x9   : > { %p1488_p2 = scmp.eq.s32.totalorder %s884_s18, 7  ;;  %p136_p3 = scmp.eq.s32.totalorder %s885_s19, 7 }
   0xa   : > { %s1759_s20 = scalar_select %p1484_p1, 1, 0 }
   0xb   : > { %s1760_s21 = scalar_select %p1488_p2, 1, 0 }
   0xc   : > { %p1494_p4 = por %p1484_p1, %p52_p0  ;;  %p886_p5 = scmp.ge.s32.totalorder %s1421_s17, 1 }
   0xd   : > { %p1499_p6 = por %p136_p3, %p52_p0  ;;  %p143_p7 = scmp.lt.s32.totalorder %s1421_s17, 9 }
   0xe   : > { %s1761_s22 = scalar_select %p1494_p4, 1, 0 }
   0xf   : > { %s1762_s23 = scalar_select %p1499_p6, 1, 0 }
  0x10   : > { %p1504_p8 = pnand %p886_p5, %p143_p7  ;;  %s1423_s25 = smov [#allocation5]  }
  0x11   : > { %s157_s26 = sshll.u32 %s1423_s25, 4  ;;  %s32_s28 = sadd.s32 1, %s1417_s16  ;;  %s158_s26 = int_to_ptr.vmem [resolvable:$true] %s157_s26 }
  0x12   : > { %s1763_s24 = scalar_select %p1504_p8, 1, 0 }
  0x13   : > { %p1184_p9 = pneg %p1504_p8  ;;  %s1277_s4 = scalar_lea.hbm %s1752_s1, 1024 }
  0x14   : > { %p1278_p11 = scmp.ne.s32.totalorder %s1752_s1, %s1277_s4  ;;  %p1284_p3 = scmp.lt.u32.totalorder %s1277_s4, %s1752_s1 }
  0x15   : > { %p1512_p10 = pnand %p1184_p9, %p1484_p1 }
  0x17   : > { %p1279_p12 = pneg %p1512_p10 }
  0x19   : > { %p1280_p13 = pnand %p1279_p12, %p1278_p11 }
  0x1b   : > { %p1281_p0 = pneg %p1280_p13 }
  0x1d   : > { %p1286_p5 = pnand %p1284_p3, %p1281_p0 }
  0x1f   : > { %1289 = shalt.err (!%p1286_p5)
}
  0x20   : > { %s1290_s9 = scalar_lea.vmem %s158_s26, 1024  ;;  %p1298_p1 = scmp.lt.s32.totalorder %s158_s26, %s158_s26 }
  0x21   : > { %p1291_p7 = scmp.ne.s32.totalorder %s158_s26, %s1290_s9  ;;  %p1299_p4 = scmp.lt.s32.totalorder %s1290_s9, %s1290_s9 }
  0x23   : > { %p1293_p9 = pnand %p1291_p7, %p1279_p12  ;;  %p1300_p8 = por %p1299_p4, %p1298_p1 }
  0x25   : > { %p1294_p6 = pneg %p1293_p9 }
  0x27   : > { %p1301_p2 = pnand %p1300_p8, %p1294_p6 }
  0x29   : > { %1304 = shalt.err (!%p1301_p2)
}
  0x2a   : > { %s1424_s10 = smov 64   ;;  %s1425_s11 = smov 4  }
  0x2b   : > { %1187 = dma.hbm_to_vmem [thread:$0]  (!%p1512_p10), %s1752_s1, 1024, %s158_s26, [#allocation6], %s1424_s10, %s1424_s10, %s1425_s11  }
  0x2c   : > { %p34_p1 = scmp.ge.s32.totalorder %s32_s28, 8  ;;  %s39_s25 = sadd.s32 1, %s1409_s14 }
  0x2d   : > { %p46_p2 = scmp.ne.s32.totalorder %s1409_s14, %s1405_s13  ;;  %p47_p4 = scmp.eq.s32.totalorder %s1421_s17, 0 }
  0x2e   : > { %s1779_s28 = smov (%p34_p1, %s32_s28), 0  ;;  %p1766_p8 = scmp.ne.s32.totalorder %s1760_s21, 0 }
  0x2f   : > { %p1542_p6 = por %p47_p4, %p46_p2  ;;  %s36_s30 = ssub.s32 %s1417_s16, %s1779_s28 }
  0x30   : > { %p1548_p11 = por %p1766_p8, %p46_p2  ;;  %p1197_p12 = scmp.lt.s32.totalorder %s1421_s17, 8 }
  0x31   : > { %p37_p10 = scmp.eq.s32.totalorder %s36_s30, 0  ;;  %s177_s26 = sand.u32 1, %s1409_s14  }
  0x32   : > { %s890_s4 = sshll.u32 %s177_s26, 7  ;;  %s959_s6 = sshll.u32 %s1417_s16, 11 }
  0x33   : > { %s1557_s5 = scalar_select %p37_p10, %s1409_s14, %s39_s25  }
  0x34   : > { %s1563_s9 = scalar_lea.hbm %s1751_s0, %s959_s6  ;;  %s181_s21 = scalar_lea.vmem [#allocation2], %s890_s4 }
  0x35   : > { %s188_s18 = sshll.u32 %s181_s21, 4  ;;  %p1569_p13 = pnand %p1197_p12, %p1542_p6  ;;  %s1565_s18 = int_to_ptr.vmem [resolvable:$true] %s188_s18 }
  0x36   : > { %s1573_s25 = scalar_lea.sflag [#allocation3], %s177_s26  ;;  %s1305_s30 = scalar_lea.hbm %s1563_s9, 2048 }
  0x37   : > { %p1306_p0 = scmp.ne.s32.totalorder %s1563_s9, %s1305_s30  ;;  %p1307_p3 = pneg %p1569_p13 }
  0x38   : > { %s1310_s29 = scalar_lea.hbm %s1751_s0, 16384  ;;  %p1311_p9 = scmp.lt.u32.totalorder %s1563_s9, %s1751_s0 }
  0x39   : > { %p1308_p5 = pnand %p1307_p3, %p1306_p0  ;;  %p1312_p1 = scmp.lt.u32.totalorder %s1310_s29, %s1305_s30 }
  0x3a   : > { %p1314_p4 = scmp.lt.u32.totalorder %s1305_s30, %s1563_s9 }
  0x3b   : > { %p1309_p7 = pneg %p1308_p5  ;;  %p1313_p2 = por %p1312_p1, %p1311_p9 }
  0x3d   : > { %p1315_p6 = por %p1314_p4, %p1313_p2 }
  0x3f   : > { %p1316_p8 = pnand %p1315_p6, %p1309_p7 }
  0x41   : > { %1319 = shalt.err (!%p1316_p8)
}
  0x42   : > { %s1320_s26 = scalar_lea.vmem %s1565_s18, 2048  ;;  %s1426_s21 = smov [#allocation2]  }
  0x43   : > { %p1321_p12 = scmp.ne.s32.totalorder %s1565_s18, %s1320_s26  ;;  %s1325_s4 = sshll.u32 %s1426_s21, 4  ;;  %s1326_s4 = int_to_ptr.vmem [resolvable:$false] %s1325_s4 }
  0x44   : > { %s1327_s6 = scalar_lea.vmem %s1326_s4, 4096  ;;  %p1328_p5 = scmp.lt.s32.totalorder %s1565_s18, %s1326_s4 }
  0x45   : > { %p1323_p10 = pnand %p1321_p12, %p1307_p3  ;;  %p1329_p9 = scmp.lt.s32.totalorder %s1327_s6, %s1320_s26 }
  0x47   : > { %p1324_p0 = pneg %p1323_p10  ;;  %p1330_p1 = por %p1329_p9, %p1328_p5 }
  0x49   : > { %p1331_p2 = pnand %p1330_p1, %p1324_p0 }
  0x4b   : > { %1334 = shalt.err (!%p1331_p2)
}
  0x4c   : > { %1191 = dma.hbm_to_vmem [thread:$0]  (!%p1569_p13), %s1563_s9, 2048, %s1565_s18, %s1573_s25, %s1424_s10, %s1424_s10, %s1425_s11  }
  0x4d   : > { %p1769_p3 = scmp.ne.s32.totalorder %s1763_s24, 0 }
  0x4e   : > { %s1607_s30 = sand.u32 (!%p1769_p3), 1, %s1405_s13   ;;  %p1770_p7 = scmp.ne.s32.totalorder (!%p1769_p3), %s1761_s22, 0 }
  0x4f   : > { %200 = sbr.rel (%p1769_p3) target bundleno = 381 (0x17d), region = 32  ;;  %s894_s29 = sshll.u32 (!%p1769_p3), %s1607_s30, 7 }
  0x50   : > { %s203_s7 = scalar_lea.sflag (!%p1769_p3), [#allocation3], %s1607_s30  ;;  %s1613_s19 = scalar_lea.vmem (!%p1769_p3), [#allocation2], %s894_s29 }
  0x56   : > { %1388 = dma.done.wait (%p1770_p7), %s203_s7, 2048  }
  0x57   : > { %1390 = vsyncadd (%p1770_p7), %s203_s7, 4294965248  ;;  %p1771_p13 = scmp.ne.s32.totalorder %s1759_s20, 0 }
  0x59   : > { %1392 = dma.done.wait (%p1771_p13), [#allocation6], 1024  }
  0x5a   : > { %1394 = vsyncadd (%p1771_p13), [#allocation6], 4294966272  ;;  %v1253_v0 = vld [vmem:[#allocation5] sm:$0xff]   ;;  %v1254_v1 = vld [vmem:[#allocation5 + $0x8] sm:$0xff]   ;;  %s1654_s24 = scalar_lea.vmem [#allocation7], %s894_s29  ;;  %s992_s10 = sshll.u32 %s1413_s15, 11 }
  0x5b   : > { %1112 = vmatprep.subr.bf16.mxu0 %v1253_v0  ;;  %1160 = vmatprep.subr.bf16.mxu1 %v1253_v0  ;;  %v1255_v2 = vld [vmem:[#allocation5 + $0x10] sm:$0xff]   ;;  %v1256_v3 = vld [vmem:[#allocation5 + $0x18] sm:$0xff]   ;;  %v1261_v4 = vld [vmem:[%s1613_s19] sm:$0xff]   ;;  %s777_s11 = sshll.u32 %s1654_s24, 4  ;;  %s1697_s18 = scalar_lea.hbm %s1754_s3, %s992_s10  ;;  %s1699_s11 = int_to_ptr.vmem [resolvable:$true] %s777_s11 }
  0x5c   : > { %1113 = vmatpush3.bf16.msra.mxu0 %v1253_v0  ;;  %1168 = vmatpush3.bf16.msra.mxu1 %v1253_v0  ;;  %v1262_v5 = vld [vmem:[%s1613_s19 + $0x40] sm:$0xff]   ;;  %v1258_v7 = vld [vmem:[#allocation5 + $0x28] sm:$0xff]   ;;  %v1259_v8 = vld [vmem:[#allocation5 + $0x30] sm:$0xff]   ;;  %s763_s25 = scalar_lea.sflag [#allocation4], %s1607_s30  ;;  %s1335_s8 = scalar_lea.vmem %s1699_s11, 2048 }
  0x5d   : > { %1114 = vmatprep.subr.bf16.mxu0 %v1254_v1  ;;  %1161 = vmatprep.subr.bf16.mxu1 %v1254_v1  ;;  %v1257_v6 = vld [vmem:[#allocation5 + $0x20] sm:$0xff]   ;;  %v1260_v9 = vld [vmem:[#allocation5 + $0x38] sm:$0xff]   ;;  %v1263_v10 = vld [vmem:[%s1613_s19 + $0x8] sm:$0xff]   ;;  %p1336_p4 = scmp.ne.s32.totalorder %s1699_s11, %s1335_s8  ;;  %s1427_s26 = smov [#allocation7]  }
  0x5e   : > { %1128 = vmatprep.mubr.bf16.mxu0 %v1261_v4  ;;  %1144 = vmatprep.mubr.bf16.mxu1 %v1262_v5  ;;  %v1264_v11 = vld [vmem:[%s1613_s19 + $0x48] sm:$0xff]   ;;  %v1265_v12 = vld [vmem:[%s1613_s19 + $0x10] sm:$0xff]   ;;  %v1267_v14 = vld [vmem:[%s1613_s19 + $0x18] sm:$0xff]   ;;  %s1339_s21 = sshll.u32 %s1427_s26, 4  ;;  %s1340_s21 = int_to_ptr.vmem [resolvable:$false] %s1339_s21 }
  0x5f   : > { %v1266_v13 = vld [vmem:[%s1613_s19 + $0x50] sm:$0xff]   ;;  %v1268_v15 = vld [vmem:[%s1613_s19 + $0x58] sm:$0xff]   ;;  %v1269_v16 = vld [vmem:[%s1613_s19 + $0x20] sm:$0xff]   ;;  %p1337_p6 = pnand %p1336_p4, %p1548_p11  ;;  %s1341_s4 = scalar_lea.vmem %s1340_s21, 4096 }
  0x60   : > { %1115 = vmatpush3.bf16.msra.mxu0 %v1254_v1  ;;  %1169 = vmatpush3.bf16.msra.mxu1 %v1254_v1  ;;  %v1270_v17 = vld [vmem:[%s1613_s19 + $0x60] sm:$0xff]   ;;  %v1271_v18 = vld [vmem:[%s1613_s19 + $0x28] sm:$0xff]   ;;  %v1273_v20 = vld [vmem:[%s1613_s19 + $0x30] sm:$0xff]   ;;  %p1342_p12 = scmp.lt.s32.totalorder %s1699_s11, %s1340_s21  ;;  %p1343_p10 = scmp.lt.s32.totalorder %s1341_s4, %s1335_s8 }
  0x61   : > { %1116 = vmatprep.subr.bf16.mxu0 %v1255_v2  ;;  %1162 = vmatprep.subr.bf16.mxu1 %v1255_v2  ;;  %v1272_v19 = vld [vmem:[%s1613_s19 + $0x68] sm:$0xff]   ;;  %v1274_v21 = vld [vmem:[%s1613_s19 + $0x70] sm:$0xff]   ;;  %v1275_v22 = vld [vmem:[%s1613_s19 + $0x38] sm:$0xff]   ;;  %p1338_p8 = pneg %p1337_p6 }
  0x62   : > { %v1276_v23 = vld [vmem:[%s1613_s19 + $0x78] sm:$0xff]   ;;  %v1642_v25 = vld [vmem:[%s1753_s2] ss:$0 sm:$0xff]  ;;  %p1344_p0 = por %p1343_p10, %p1342_p12 }
  0x64   : > { %1117 = vmatpush3.bf16.msra.mxu0 %v1255_v2  ;;  %1170 = vmatpush3.bf16.msra.mxu1 %v1255_v2  ;;  %p1345_p5 = pnand %p1344_p0, %p1338_p8 }
  0x65   : > { %1118 = vmatprep.subr.bf16.mxu0 %v1256_v3  ;;  %1163 = vmatprep.subr.bf16.mxu1 %v1256_v3 }
  0x68   : > { %1119 = vmatpush3.bf16.msra.mxu0 %v1256_v3  ;;  %1171 = vmatpush3.bf16.msra.mxu1 %v1256_v3 }
  0x69   : > { %1120 = vmatprep.subr.bf16.mxu0 %v1257_v6  ;;  %1164 = vmatprep.subr.bf16.mxu1 %v1257_v6 }
  0x6c   : > { %1121 = vmatpush3.bf16.msra.mxu0 %v1257_v6  ;;  %1172 = vmatpush3.bf16.msra.mxu1 %v1257_v6 }
  0x6d   : > { %1122 = vmatprep.subr.bf16.mxu0 %v1258_v7  ;;  %1165 = vmatprep.subr.bf16.mxu1 %v1258_v7 }
  0x70   : > { %1123 = vmatpush3.bf16.msra.mxu0 %v1258_v7  ;;  %1173 = vmatpush3.bf16.msra.mxu1 %v1258_v7 }
  0x71   : > { %1124 = vmatprep.subr.bf16.mxu0 %v1259_v8  ;;  %1166 = vmatprep.subr.bf16.mxu1 %v1259_v8 }
  0x74   : > { %1125 = vmatpush3.bf16.msra.mxu0 %v1259_v8  ;;  %1174 = vmatpush3.bf16.msra.mxu1 %v1259_v8 }
  0x75   : > { %1126 = vmatprep.subr.bf16.mxu0 %v1260_v9  ;;  %1167 = vmatprep.subr.bf16.mxu1 %v1260_v9 }
  0x78   : > { %1127 = vmatpush3.bf16.msra.mxu0 %v1260_v9  ;;  %1175 = vmatpush3.bf16.msra.mxu1 %v1260_v9 }
  0x7b   : > { %1129 = vmatmul.mubr.bf16.vlgmr.msra.gmra.mrb[0].mxu0 %v1263_v10  ;;  %1145 = vmatmul.mubr.bf16.vlgmr.msra.gmra.mrb[0].mxu1 %v1264_v11 }
  0x7c   : > { %1132 = vmatprep.mubr.bf16.mxu0 %v1265_v12  ;;  %1148 = vmatprep.mubr.bf16.mxu1 %v1266_v13 }
  0x83   : > { %1133 = vmatmul.mubr.bf16.gmra.mrb[4].mxu0 %v1267_v14  ;;  %1149 = vmatmul.mubr.bf16.gmra.mrb[4].mxu1 %v1268_v15 }
  0x84   : > { %1136 = vmatprep.mubr.bf16.mxu0 %v1269_v16  ;;  %1152 = vmatprep.mubr.bf16.mxu1 %v1270_v17 }
  0x8b   : > { %1137 = vmatmul.mubr.bf16.gmra.mrb[8].mxu0 %v1271_v18  ;;  %1153 = vmatmul.mubr.bf16.gmra.mrb[8].mxu1 %v1272_v19 }
  0x8c   : > { %1140 = vmatprep.mubr.bf16.mxu0 %v1273_v20  ;;  %1156 = vmatprep.mubr.bf16.mxu1 %v1274_v21 }
  0x93   : > { %1141 = vmatmul.mubr.bf16.gmra.mrb[12].mxu0 %v1275_v22  ;;  %1157 = vmatmul.mubr.bf16.gmra.mrb[12].mxu1 %v1276_v23 }
 0x14e   : > { %v1130_v24 = vpop.f32.mrb[0].mxu0  ;;  %v1146_v26 = vpop.f32.mrb[0].mxu1 }
 0x14f   : > { %v475_v27 = vpop.f32.mrb[1].mxu0  ;;  %v539_v28 = vpop.f32.mrb[1].mxu1  ;;  %v484_v31 = vadd.f32 %v1130_v24, %v1642_v25  ;;  %v548_v32 = vadd.f32 %v1146_v26, %v1642_v25 }
 0x150   : > { %v1131_v29 = vpop.f32.mrb[2].mxu0  ;;  %v1147_v30 = vpop.f32.mrb[2].mxu1  ;;  %v476_v37 = vadd.f32 %v1642_v25, %v475_v27  ;;  %v540_v38 = vadd.f32 %v1642_v25, %v539_v28 }
 0x151   : > { %v487_v33 = vadd.f32 %v1131_v29, %v1642_v25  ;;  %v551_v34 = vadd.f32 %v1147_v30, %v1642_v25  ;;  %v478_v35 = vpop.f32.mrb[3].mxu0  ;;  %v542_v36 = vpop.f32.mrb[3].mxu1 }
 0x152   : > { %v479_v39 = vadd.f32 %v1642_v25, %v478_v35  ;;  %v543_v40 = vadd.f32 %v1642_v25, %v542_v36 }
 0x153   : > { %v1001_v41 = vpack.c.bf16 %v487_v33, %v484_v31  ;;  %v1041_v42 = vpack.c.bf16 %v551_v34, %v548_v32 }
 0x154   : > { %v996_v43 = vpack.c.bf16 %v479_v39, %v476_v37  ;;  %v1036_v44 = vpack.c.bf16 %v543_v40, %v540_v38 }
 0x155   : > { %1073 = vst [vmem:[%s1654_s24 + $0x8] sm:$0xff] %v1001_v41   ;;  %1081 = vst [vmem:[%s1654_s24 + $0x48] sm:$0xff] %v1041_v42  }
 0x156   : > { %997 = vst [vmem:[%s1654_s24] sm:$0xff] %v996_v43   ;;  %1080 = vst [vmem:[%s1654_s24 + $0x40] sm:$0xff] %v1036_v44   ;;  %v1134_v45 = vpop.f32.mrb[4].mxu0  ;;  %v1150_v46 = vpop.f32.mrb[4].mxu1 }
 0x157   : > { %v491_v47 = vpop.f32.mrb[5].mxu0  ;;  %v555_v48 = vpop.f32.mrb[5].mxu1  ;;  %v500_v51 = vadd.f32 %v1134_v45, %v1642_v25  ;;  %v564_v52 = vadd.f32 %v1150_v46, %v1642_v25 }
 0x158   : > { %v1135_v49 = vpop.f32.mrb[6].mxu0  ;;  %v1151_v50 = vpop.f32.mrb[6].mxu1  ;;  %v492_v57 = vadd.f32 %v1642_v25, %v491_v47  ;;  %v556_v58 = vadd.f32 %v1642_v25, %v555_v48 }
 0x159   : > { %v503_v53 = vadd.f32 %v1135_v49, %v1642_v25  ;;  %v567_v54 = vadd.f32 %v1151_v50, %v1642_v25  ;;  %v494_v55 = vpop.f32.mrb[7].mxu0  ;;  %v558_v56 = vpop.f32.mrb[7].mxu1 }
 0x15a   : > { %v495_v59 = vadd.f32 %v1642_v25, %v494_v55  ;;  %v559_v60 = vadd.f32 %v1642_v25, %v558_v56 }
 0x15b   : > { %v1011_v61 = vpack.c.bf16 %v503_v53, %v500_v51  ;;  %v1051_v62 = vpack.c.bf16 %v567_v54, %v564_v52 }
 0x15c   : > { %v1006_v63 = vpack.c.bf16 %v495_v59, %v492_v57  ;;  %v1046_v0 = vpack.c.bf16 %v559_v60, %v556_v58 }
 0x15d   : > { %1075 = vst [vmem:[%s1654_s24 + $0x18] sm:$0xff] %v1011_v61   ;;  %1083 = vst [vmem:[%s1654_s24 + $0x58] sm:$0xff] %v1051_v62  }
 0x15e   : > { %1074 = vst [vmem:[%s1654_s24 + $0x10] sm:$0xff] %v1006_v63   ;;  %1082 = vst [vmem:[%s1654_s24 + $0x50] sm:$0xff] %v1046_v0   ;;  %v1138_v1 = vpop.f32.mrb[8].mxu0  ;;  %v1154_v2 = vpop.f32.mrb[8].mxu1 }
 0x15f   : > { %v507_v3 = vpop.f32.mrb[9].mxu0  ;;  %v571_v4 = vpop.f32.mrb[9].mxu1  ;;  %v516_v7 = vadd.f32 %v1138_v1, %v1642_v25  ;;  %v580_v8 = vadd.f32 %v1154_v2, %v1642_v25 }
 0x160   : > { %v1139_v5 = vpop.f32.mrb[10].mxu0  ;;  %v1155_v6 = vpop.f32.mrb[10].mxu1  ;;  %v508_v13 = vadd.f32 %v1642_v25, %v507_v3  ;;  %v572_v14 = vadd.f32 %v1642_v25, %v571_v4 }
 0x161   : > { %v519_v9 = vadd.f32 %v1139_v5, %v1642_v25  ;;  %v583_v10 = vadd.f32 %v1155_v6, %v1642_v25  ;;  %v510_v11 = vpop.f32.mrb[11].mxu0  ;;  %v574_v12 = vpop.f32.mrb[11].mxu1 }
 0x162   : > { %v511_v15 = vadd.f32 %v1642_v25, %v510_v11  ;;  %v575_v16 = vadd.f32 %v1642_v25, %v574_v12 }
 0x163   : > { %v1021_v17 = vpack.c.bf16 %v519_v9, %v516_v7  ;;  %v1061_v18 = vpack.c.bf16 %v583_v10, %v580_v8 }
 0x164   : > { %v1016_v19 = vpack.c.bf16 %v511_v15, %v508_v13  ;;  %v1056_v20 = vpack.c.bf16 %v575_v16, %v572_v14 }
 0x165   : > { %1077 = vst [vmem:[%s1654_s24 + $0x28] sm:$0xff] %v1021_v17   ;;  %1085 = vst [vmem:[%s1654_s24 + $0x68] sm:$0xff] %v1061_v18  }
 0x166   : > { %1076 = vst [vmem:[%s1654_s24 + $0x20] sm:$0xff] %v1016_v19   ;;  %1084 = vst [vmem:[%s1654_s24 + $0x60] sm:$0xff] %v1056_v20   ;;  %v1142_v21 = vpop.f32.mrb[12].mxu0  ;;  %v1158_v22 = vpop.f32.mrb[12].mxu1 }
 0x167   : > { %v523_v23 = vpop.f32.mrb[13].mxu0  ;;  %v587_v24 = vpop.f32.mrb[13].mxu1  ;;  %v532_v28 = vadd.f32 %v1142_v21, %v1642_v25  ;;  %v596_v29 = vadd.f32 %v1158_v22, %v1642_v25 }
 0x168   : > { %v1143_v26 = vpop.f32.mrb[14].mxu0  ;;  %v1159_v27 = vpop.f32.mrb[14].mxu1  ;;  %v524_v34 = vadd.f32 %v1642_v25, %v523_v23  ;;  %v588_v35 = vadd.f32 %v1642_v25, %v587_v24 }
 0x169   : > { %v535_v30 = vadd.f32 %v1143_v26, %v1642_v25  ;;  %v599_v31 = vadd.f32 %v1159_v27, %v1642_v25  ;;  %v526_v32 = vpop.f32.mrb[15].mxu0  ;;  %v590_v33 = vpop.f32.mrb[15].mxu1 }
 0x16a   : > { %v527_v36 = vadd.f32 %v1642_v25, %v526_v32  ;;  %v591_v37 = vadd.f32 %v1642_v25, %v590_v33 }
 0x16b   : > { %v1031_v38 = vpack.c.bf16 %v535_v30, %v532_v28  ;;  %v1071_v39 = vpack.c.bf16 %v599_v31, %v596_v29 }
 0x16c   : > { %v1026_v40 = vpack.c.bf16 %v527_v36, %v524_v34  ;;  %v1066_v41 = vpack.c.bf16 %v591_v37, %v588_v35 }
 0x16d   : > { %1079 = vst [vmem:[%s1654_s24 + $0x38] sm:$0xff] %v1031_v38   ;;  %1087 = vst [vmem:[%s1654_s24 + $0x78] sm:$0xff] %v1071_v39  }
 0x16e   : > { %1078 = vst [vmem:[%s1654_s24 + $0x30] sm:$0xff] %v1026_v40   ;;  %1086 = vst [vmem:[%s1654_s24 + $0x70] sm:$0xff] %v1066_v41  }
 0x16f   : > { %1348 = shalt.err (!%p1345_p5)
}
 0x170   : > { %s1349_s6 = scalar_lea.hbm %s1697_s18, 2048  ;;  %s1353_s19 = scalar_lea.hbm %s1754_s3, 16384 }
 0x171   : > { %p1350_p9 = scmp.ne.s32.totalorder %s1697_s18, %s1349_s6  ;;  %p1354_p3 = scmp.lt.u32.totalorder %s1697_s18, %s1754_s3 }
 0x172   : > { %p1355_p7 = scmp.lt.u32.totalorder %s1353_s19, %s1349_s6  ;;  %p1357_p4 = scmp.lt.u32.totalorder %s1349_s6, %s1697_s18 }
 0x173   : > { %p1351_p1 = pnand %p1350_p9, %p1548_p11 }
 0x174   : > { %p1356_p13 = por %p1355_p7, %p1354_p3 }
 0x175   : > { %p1352_p2 = pneg %p1351_p1 }
 0x176   : > { %p1358_p6 = por %p1357_p4, %p1356_p13 }
 0x178   : > { %p1359_p8 = pnand %p1358_p6, %p1352_p2 }
 0x17a   : > { %1362 = shalt.err (!%p1359_p8)
}
 0x17b   : > { %s1428_s24 = smov 64   ;;  %s1429_s10 = smov 4  }
 0x17c   : > { %1182 = dma.vmem_to_hbm [thread:$0]  (%p1548_p11), %s1699_s11, 2048, %s1697_s18, %s763_s25, %s1428_s24, %s1428_s24, %s1429_s10  }
 0x17d PF: > { %p1199_p12 = scmp.ge.s32.totalorder %s1421_s17, 2  ;;  %s792_s15 = sand.u32 1, %s1401_s12  }
 0x17e   : > { %p1772_p10 = scmp.ne.s32.totalorder %s1762_s23, 0  ;;  %s793_s9 = scalar_lea.sflag [#allocation4], %s792_s15 }
 0x180   : > { %p1193_p0 = pnand %p1199_p12, %p1772_p10 }
 0x182   : > { %1396 = dma.done.wait (!%p1193_p0), %s793_s9, 2048  }
 0x183   : > { %1398 = vsyncadd (!%p1193_p0), %s793_s9, 4294965248  ;;  %s20_s17 = sadd.s32 1, %s1421_s17   ;;  %s1773_s12 = smov %s1405_s13 }
 0x184   : > { %p17_p5 = scmp.ge.s32.totalorder %s20_s17, 10   ;;  %s1774_s13 = smov %s1409_s14 }
 0x185   : > { %s1775_s14 = smov %s1557_s5  ;;  %s1776_s15 = smov %s1417_s16 }
 0x186   : > { %s1777_s16 = smov %s1779_s28  ;;  %19 = sbr.rel (!%p17_p5) target bundleno = 7 (0x7), region = 85 }
 0x18d   :  { %798 = vsyncpa [#allocation3], 1 }
 0x18e   :  { %800 = vsyncpa [#allocation3 + $0x1], 1 }
 0x18f   :  { %801 = vsyncpa [#allocation6], 1 }
 0x190   :  { %802 = vsyncpa [#allocation4], 1 }
 0x191   :  { %804 = vsyncpa [#allocation4 + $0x1], 1 }

</bundles_post_ra>
